<compile_context>
chip_gen: v6e
topology: v6e:2x2x1
jax: 0.10.0
libtpu: 0.0.40
codegen_flags: <defaults>
</compile_context>

<pallas_src>
import math
import functools

import jax
import jax.numpy as jnp
from jax.experimental import pallas as pl
from jax.experimental.pallas import tpu as pltpu


def _attention_kernel(use_tanh, C, bt, S, H,
                      qc_ref, ref_ref, wrT_ref, br_ref, v_ref,
                      ref_out_ref, logits_ref):
    qc = qc_ref[...]                 # (bt, H)  f32, = query @ Wq^T + bq (precomputed)
    r = ref_ref[...]                 # (bt, S, H) compute dtype (f32 or bf16)
    wrT = wrT_ref[...]               # (H, H)  pre-transposed Conv1d weight (in, out)
    br = br_ref[...]                 # (1, H)  f32 Conv1d bias
    v = v_ref[...]                   # (1, H)  f32

    # Conv1d(k=1) == per-position linear: one large MXU matmul over bt*S rows.
    r2 = r.reshape(bt * S, H)
    r_mm = jnp.dot(r2, wrT, preferred_element_type=jnp.float32)   # (bt*S, H) f32
    r_proj = (r_mm + br).reshape(bt, S, H)                        # + bias -> ref_proj

    t = jnp.tanh(qc[:, None, :] + r_proj)                         # (bt, S, H)
    logits = jnp.sum(t * v[None, :, :], axis=-1)                  # (bt, S)  XLU reduce
    if use_tanh:
        logits = C * jnp.tanh(logits)

    # Lane-dense stores (last dim = H for ref_proj, S for logits); no transpose.
    ref_out_ref[...] = r_proj.astype(ref_out_ref.dtype)
    logits_ref[...] = logits.astype(logits_ref.dtype)


def _pick_block_batch(B, S, H, in_itemsize,
                      budget_bytes=8 * 1024 * 1024, target_rows=256):
    """Largest batch-block that keeps double-buffered tiles well inside VMEM
    (conservative for v7x's 64 MiB physical / 32 MiB scoped default)."""
    divisors = [d for d in range(1, B + 1) if B % d == 0]

    def fits(d):
        blk = (2 * d * S * H * in_itemsize     # ref input (double-buffered)
               + 2 * d * S * H * 4             # ref_proj output
               + 2 * d * S * 4                 # logits output
               + 2 * d * H * 4                 # qc input
               + 2 * H * H * in_itemsize)      # weight
        return blk <= budget_bytes

    aligned = [d for d in divisors if fits(d) and (d == B or d % 8 == 0)]
    for d in aligned:
        if d * S >= target_rows:
            return d
    if aligned:
        return aligned[-1]
    fitting = [d for d in divisors if fits(d)]
    return fitting[-1] if fitting else 1


def attention_forward(query, ref, wq, bq, wr, br, v, *,
                      use_tanh=False, C=10.0,
                      compute_dtype=jnp.float32, block_batch=None):
    """query: [B, H], ref: [B, S, H].  Returns (ref_proj [B, H, S], logits [B, S])."""
    B, S, H = ref.shape
    assert query.shape == (B, H)

    # Hoisted query projection (tiny matmul, done once by XLA, not per grid step).
    qc = (query.astype(jnp.float32) @ wq.T.astype(jnp.float32)
          + bq.astype(jnp.float32)).astype(jnp.float32)             # (B, H)

    wrT = jnp.asarray(wr.T, dtype=compute_dtype)                    # (H_in, H_out)
    ref_c = ref.astype(compute_dtype)
    br2 = br.reshape(1, H).astype(jnp.float32)
    v2 = v.reshape(1, H).astype(jnp.float32)

    if block_batch is None:
        bt = _pick_block_batch(B, S, H, jnp.dtype(compute_dtype).itemsize)
    else:
        bt = int(block_batch)
        assert B % bt == 0, "block_batch must divide the batch size"
    nb = B // bt

    kernel = functools.partial(_attention_kernel, bool(use_tanh), float(C), bt, S, H)

    ref_proj_bsh, logits = pl.pallas_call(
        kernel,
        out_shape=(
            jax.ShapeDtypeStruct((B, S, H), jnp.float32),
            jax.ShapeDtypeStruct((B, S), jnp.float32),
        ),
        grid_spec=pltpu.PrefetchScalarGridSpec(
            num_scalar_prefetch=0,
            grid=(nb,),
            in_specs=[
                pl.BlockSpec((bt, H), lambda b: (b, 0)),        # qc (query proj)
                pl.BlockSpec((bt, S, H), lambda b: (b, 0, 0)),  # ref
                pl.BlockSpec((H, H), lambda b: (0, 0)),         # W_ref^T
                pl.BlockSpec((1, H), lambda b: (0, 0)),         # Conv1d bias
                pl.BlockSpec((1, H), lambda b: (0, 0)),         # V
            ],
            out_specs=[
                pl.BlockSpec((bt, S, H), lambda b: (b, 0, 0)),  # ref_proj [B,S,H]
                pl.BlockSpec((bt, S), lambda b: (b, 0)),        # logits
            ],
        ),
        compiler_params=pltpu.CompilerParams(
            dimension_semantics=("parallel",)),
    )(qc, ref_c, wrT, br2, v2)

    # PyTorch returns ref_proj as [B, H, S]; do the transpose once in XLA.
    ref_proj = jnp.transpose(ref_proj_bsh, (0, 2, 1))
    return ref_proj, logits


def _reference(query, ref, wq, bq, wr, br, v, use_tanh=False, C=10.0):
    q_proj = query @ wq.T + bq                          # (B, H)
    r_proj = jnp.einsum("bsh,oh->bso", ref, wr) + br    # (B, S, H)
    t = jnp.tanh(q_proj[:, None, :] + r_proj)
    logits = jnp.einsum("bsh,h->bs", t, v)
    if use_tanh:
        logits = C * jnp.tanh(logits)
    return jnp.transpose(r_proj, (0, 2, 1)), logits


if __name__ == "__main__":
    B, S, H = 2, 8, 32
    key = jax.random.PRNGKey(0)
    k_q, k_r, k_wq, k_bq, k_wr, k_br, k_v = jax.random.split(key, 7)

    query = jax.random.normal(k_q, (B, H), dtype=jnp.float32)
    ref = jax.random.normal(k_r, (B, S, H), dtype=jnp.float32)

    bound = 1.0 / math.sqrt(H)
    wq = jax.random.uniform(k_wq, (H, H), jnp.float32, -bound, bound)   # Linear weight
    bq = jax.random.uniform(k_bq, (H,), jnp.float32, -bound, bound)     # Linear bias
    wr = jax.random.uniform(k_wr, (H, H), jnp.float32, -bound, bound)   # Conv1d(k=1) weight
    br = jax.random.uniform(k_br, (H,), jnp.float32, -bound, bound)     # Conv1d bias
    v = jax.random.uniform(k_v, (H,), jnp.float32, -bound, bound)       # V parameter

    # 1) f32 path, use_tanh=False.
    ro, lg = attention_forward(query, ref, wq, bq, wr, br, v,
                               use_tanh=False, C=10.0)
    jax.block_until_ready((ro, lg))
    ro_ref, lg_ref = _reference(query, ref, wq, bq, wr, br, v,
                                use_tanh=False, C=10.0)
    assert ro.shape == (B, H, S) and lg.shape == (B, S)
    assert jnp.allclose(ro, ro_ref, atol=1e-5, rtol=1e-5)
    assert jnp.allclose(lg, lg_ref, atol=1e-5, rtol=1e-5)

    # 2) f32 path, use_tanh=True, larger batch split across grid steps (bt=8).
    B2 = 16
    k2a, k2b = jax.random.split(jax.random.PRNGKey(1), 2)
    query2 = jax.random.normal(k2a, (B2, H), dtype=jnp.float32)
    ref2 = jax.random.normal(k2b, (B2, S, H), dtype=jnp.float32)
    ro2, lg2 = attention_forward(query2, ref2, wq, bq, wr, br, v,
                                 use_tanh=True, C=10.0, block_batch=8)
    jax.block_until_ready((ro2, lg2))
    ro2_ref, lg2_ref = _reference(query2, ref2, wq, bq, wr, br, v,
                                  use_tanh=True, C=10.0)
    assert jnp.allclose(ro2, ro2_ref, atol=1e-5, rtol=1e-5)
    assert jnp.allclose(lg2, lg2_ref, atol=1e-5, rtol=1e-5)

    # 3) bf16 MXU-feed path (halves HBM/VMEM traffic), f32 accumulation.
    ro3, lg3 = attention_forward(query, ref, wq, bq, wr, br, v,
                                 use_tanh=False, C=10.0,
                                 compute_dtype=jnp.bfloat16)
    jax.block_until_ready((ro3, lg3))
    assert jnp.allclose(ro3, ro_ref, atol=1e-1, rtol=0)
    assert jnp.allclose(lg3, lg_ref, atol=1e-1, rtol=0)

    print("KERNEL_OK")
</pallas_src>

<mosaic_0001>
module attributes {stable_mosaic.version = 11 : i64} {
  func.func @_attention_kernel(%arg0: i32, %arg1: memref<2x32xf32, #tpu.memory_space<vmem>>, %arg2: memref<2x8x32xf32, #tpu.memory_space<vmem>>, %arg3: memref<32x32xf32, #tpu.memory_space<vmem>>, %arg4: memref<1x32xf32, #tpu.memory_space<vmem>>, %arg5: memref<1x32xf32, #tpu.memory_space<vmem>>, %arg6: memref<2x8x32xf32, #tpu.memory_space<vmem>>, %arg7: memref<2x8xf32, #tpu.memory_space<vmem>>) attributes {dimension_semantics = [#tpu.dimension_semantics<parallel>], iteration_bounds = array<i64: 1>, scalar_prefetch = 0 : i64, scratch_operands = 0 : i64, tpu.core_type = #tpu.core_type<tc>, window_params = [{transform_indices = @transform_0, window_bounds = array<i64: 2, 32>}, {transform_indices = @transform_1, window_bounds = array<i64: 2, 8, 32>}, {pipeline_mode = #tpu.pipeline_mode<synchronous>, transform_indices = @transform_2, window_bounds = array<i64: 32, 32>}, {pipeline_mode = #tpu.pipeline_mode<synchronous>, transform_indices = @transform_3, window_bounds = array<i64: 1, 32>}, {pipeline_mode = #tpu.pipeline_mode<synchronous>, transform_indices = @transform_4, window_bounds = array<i64: 1, 32>}, {transform_indices = @transform_5, window_bounds = array<i64: 2, 8, 32>}, {transform_indices = @transform_6, window_bounds = array<i64: 2, 8>}]} {
    %c0 = arith.constant 0 : index
    %c0_0 = arith.constant 0 : index
    %0 = vector.load %arg1[%c0, %c0_0] : memref<2x32xf32, #tpu.memory_space<vmem>>, vector<2x32xf32>
    %c0_1 = arith.constant 0 : index
    %c0_2 = arith.constant 0 : index
    %c0_3 = arith.constant 0 : index
    %1 = vector.load %arg2[%c0_1, %c0_2, %c0_3] : memref<2x8x32xf32, #tpu.memory_space<vmem>>, vector<2x8x32xf32>
    %c0_4 = arith.constant 0 : index
    %c0_5 = arith.constant 0 : index
    %2 = vector.load %arg3[%c0_4, %c0_5] : memref<32x32xf32, #tpu.memory_space<vmem>>, vector<32x32xf32>
    %c0_6 = arith.constant 0 : index
    %c0_7 = arith.constant 0 : index
    %3 = vector.load %arg4[%c0_6, %c0_7] : memref<1x32xf32, #tpu.memory_space<vmem>>, vector<1x32xf32>
    %c0_8 = arith.constant 0 : index
    %c0_9 = arith.constant 0 : index
    %4 = vector.load %arg5[%c0_8, %c0_9] : memref<1x32xf32, #tpu.memory_space<vmem>>, vector<1x32xf32>
    %5 = vector.shape_cast %1 : vector<2x8x32xf32> to vector<16x32xf32>
    %cst = arith.constant dense<0.000000e+00> : vector<16x32xf32>
    %6 = tpu.matmul %5, %2, %cst {dimension_numbers = #tpu.dot_dimension_numbers<[1], [0], [0], [1], [0, 0, 1, 1], [], []>} : vector<16x32xf32>, vector<32x32xf32>, vector<16x32xf32> -> vector<16x32xf32>
    %7 = vector.broadcast %3 : vector<1x32xf32> to vector<16x32xf32>
    %8 = arith.addf %6, %7 : vector<16x32xf32>
    %9 = vector.shape_cast %8 : vector<16x32xf32> to vector<2x8x32xf32>
    %10 = vector.shape_cast %0 : vector<2x32xf32> to vector<2x1x32xf32>
    %11 = vector.broadcast %10 : vector<2x1x32xf32> to vector<2x8x32xf32>
    %12 = arith.addf %11, %9 : vector<2x8x32xf32>
    %13 = math.tanh %12 : vector<2x8x32xf32>
    %14 = vector.shape_cast %4 : vector<1x32xf32> to vector<1x1x32xf32>
    %15 = vector.broadcast %14 : vector<1x1x32xf32> to vector<2x8x32xf32>
    %16 = arith.mulf %13, %15 : vector<2x8x32xf32>
    %cst_10 = arith.constant dense<0.000000e+00> : vector<2x8xf32>
    %17 = vector.multi_reduction <add>, %16, %cst_10 [2] : vector<2x8x32xf32> to vector<2x8xf32>
    %c0_11 = arith.constant 0 : index
    %c0_12 = arith.constant 0 : index
    %c0_13 = arith.constant 0 : index
    %18 = vector.load %arg6[%c0_11, %c0_12, %c0_13] : memref<2x8x32xf32, #tpu.memory_space<vmem>>, vector<2x8x32xf32>
    tpu.vector_store %arg6[%c0_11, %c0_12, %c0_13], %9 {strides = array<i32>} : memref<2x8x32xf32, #tpu.memory_space<vmem>>, vector<2x8x32xf32>,
    %c0_14 = arith.constant 0 : index
    %c0_15 = arith.constant 0 : index
    %19 = vector.load %arg7[%c0_14, %c0_15] : memref<2x8xf32, #tpu.memory_space<vmem>>, vector<2x8xf32>
    tpu.vector_store %arg7[%c0_14, %c0_15], %17 {strides = array<i32>} : memref<2x8xf32, #tpu.memory_space<vmem>>, vector<2x8xf32>,
    return
  }
  func.func @transform_0(%arg0: i32) -> (i32, i32) {
    %c0_i32 = arith.constant 0 : i32
    %c0_i32_0 = arith.constant 0 : i32
    return %arg0, %c0_i32 : i32, i32
  }
  func.func @transform_1(%arg0: i32) -> (i32, i32, i32) {
    %c0_i32 = arith.constant 0 : i32
    %c0_i32_0 = arith.constant 0 : i32
    %c0_i32_1 = arith.constant 0 : i32
    return %arg0, %c0_i32, %c0_i32_0 : i32, i32, i32
  }
  func.func @transform_2(%arg0: i32) -> (i32, i32) {
    %c0_i32 = arith.constant 0 : i32
    %c0_i32_0 = arith.constant 0 : i32
    %c0_i32_1 = arith.constant 0 : i32
    return %c0_i32, %c0_i32_0 : i32, i32
  }
  func.func @transform_3(%arg0: i32) -> (i32, i32) {
    %c0_i32 = arith.constant 0 : i32
    %c0_i32_0 = arith.constant 0 : i32
    %c0_i32_1 = arith.constant 0 : i32
    return %c0_i32, %c0_i32_0 : i32, i32
  }
  func.func @transform_4(%arg0: i32) -> (i32, i32) {
    %c0_i32 = arith.constant 0 : i32
    %c0_i32_0 = arith.constant 0 : i32
    %c0_i32_1 = arith.constant 0 : i32
    return %c0_i32, %c0_i32_0 : i32, i32
  }
  func.func @transform_5(%arg0: i32) -> (i32, i32, i32) {
    %c0_i32 = arith.constant 0 : i32
    %c0_i32_0 = arith.constant 0 : i32
    %c0_i32_1 = arith.constant 0 : i32
    return %arg0, %c0_i32, %c0_i32_0 : i32, i32, i32
  }
  func.func @transform_6(%arg0: i32) -> (i32, i32) {
    %c0_i32 = arith.constant 0 : i32
    %c0_i32_0 = arith.constant 0 : i32
    return %arg0, %c0_i32 : i32, i32
  }
}

</mosaic_0001>

<bundles_post_ra>
// kernel: tpu_custom_call.1
= control target key start
LH: loop header
LB: loop body
LE: loop exit
PB: predicated region body
PF: predicated region fallthrough
CT: control target
= control target key end

     0   :  { %12 = vsyncpa [#allocation3], 0  ;;  %s483_s0 = inlined_call_operand.hbm [shape: f32[2,32], index: 0, kind: input, shape index: {}]   ;;  %s484_s1 = inlined_call_operand.hbm [shape: f32[2,8,32], index: 1, kind: input, shape index: {}]   ;;  %s485_s2 = inlined_call_operand.hbm [shape: f32[32,32], index: 2, kind: input, shape index: {}]   ;;  %s486_s3 = inlined_call_operand.vmem [shape: f32[1,32], index: 3, kind: input, shape index: {}]   ;;  %s487_s4 = inlined_call_operand.vmem [shape: f32[1,32], index: 4, kind: input, shape index: {}]   ;;  %s488_s5 = inlined_call_operand.hbm [shape: f32[2,8,32], index: 5, kind: output, shape index: {0}]   ;;  %s489_s6 = inlined_call_operand.hbm [shape: f32[2,8], index: 6, kind: output, shape index: {1}]  }
   0x1   :  { %13 = vsyncpa [#allocation6], 0 }
   0x2   :  { %14 = vsyncpa [#allocation4], 0 }
   0x3   :  { %15 = vsyncpa [#allocation10], 0  ;;  %s404_s21 = smov [#allocation5]  }
   0x4   :  { %s31_s22 = sshll.u32 %s404_s21, 4  ;;  %s32_s22 = int_to_ptr.vmem [resolvable:$true] %s31_s22 }
   0x5   :  { %s304_s23 = scalar_lea.vmem %s32_s22, 256  ;;  %p309_p1 = scmp.lt.s32.totalorder %s32_s22, %s32_s22 }
   0x6   :  { %p305_p0 = scmp.ne.s32.totalorder %s32_s22, %s304_s23  ;;  %p310_p2 = scmp.lt.s32.totalorder %s304_s23, %s304_s23 }
   0x8   :  { %p311_p3 = por %p310_p2, %p309_p1 }
   0xa   :  { %p312_p4 = pnand %p311_p3, %p305_p0 }
   0xc   :  { %315 = shalt.err (!%p312_p4)
}
   0xd   :  { %s405_s24 = smov 128   ;;  %s406_s25 = smov 8  }
   0xe   :  { %37 = dma.hbm_to_vmem [thread:$0]  %s484_s1, 256, %s32_s22, [#allocation6], %s405_s24, %s405_s24, %s406_s25  }
   0xf   :  { %s407_s28 = smov [#allocation2]   ;;  %s408_s30 = smov [#allocation7]  }
  0x10   :  { %s22_s29 = sshll.u32 %s407_s28, 4  ;;  %s43_s7 = sshll.u32 %s408_s30, 4  ;;  %s23_s29 = int_to_ptr.vmem [resolvable:$true] %s22_s29  ;;  %s44_s7 = int_to_ptr.vmem [resolvable:$true] %s43_s7 }
  0x11   :  { %s324_s8 = scalar_lea.vmem %s23_s29, 32  ;;  %p329_p6 = scmp.lt.s32.totalorder %s23_s29, %s23_s29 }
  0x12   :  { %p325_p5 = scmp.ne.s32.totalorder %s23_s29, %s324_s8  ;;  %p330_p7 = scmp.lt.s32.totalorder %s324_s8, %s324_s8 }
  0x14   :  { %p331_p8 = por %p330_p7, %p329_p6 }
  0x16   :  { %p332_p9 = pnand %p331_p8, %p325_p5 }
  0x18   :  { %335 = shalt.err (!%p332_p9)
}
  0x19   :  { %25 = dma.hbm_to_vmem [thread:$0]  %s483_s0, 32, %s23_s29, [#allocation3]  }
  0x1a   :  { %s344_s11 = scalar_lea.vmem %s44_s7, 512  ;;  %p349_p11 = scmp.lt.s32.totalorder %s44_s7, %s44_s7 }
  0x1b   :  { %p345_p10 = scmp.ne.s32.totalorder %s44_s7, %s344_s11  ;;  %p350_p12 = scmp.lt.s32.totalorder %s344_s11, %s344_s11 }
  0x1d   :  { %p351_p13 = por %p350_p12, %p349_p11 }
  0x1f   :  { %p352_p0 = pnand %p351_p13, %p345_p10 }
  0x21   :  { %355 = shalt.err (!%p352_p0)
}
  0x22   :  { %49 = dma.hbm_to_vmem [thread:$0]  %s485_s2, 512, %s44_s7, [#allocation6], %s405_s24, %s405_s24, %s406_s25  }
  0x23   :  { %396 = dma.done.wait [#allocation3], 32  }
  0x24   :  { %397 = vsyncadd [#allocation3], 4294967264 }
  0x25   :  { %398 = dma.done.wait [#allocation6], 768  }
  0x26   :  { %399 = vsyncadd [#allocation6], 4294966528  ;;  %vm78_vm0 = vcmask 261120   ;;  %v69_v0 = vld [vmem:[#allocation7 + $0x18] sm:$0xff]  ;;  %v68_v1 = vld [vmem:[#allocation7 + $0x10] sm:$0xff]  ;;  %v172_v6 = vlaneseq }
  0x27   :  { %273 = vmatprep.subr.mxu0 %v69_v0  ;;  %v64_v2 = vld [vmem:[#allocation5] sm:$0xff]  ;;  %v67_v3 = vld [vmem:[#allocation7 + $0x8] sm:$0xff]  ;;  %v66_v4 = vld [vmem:[#allocation7] sm:$0xff]  ;;  %v409_v10 = vmov 1966171168  }
  0x28   :  { %274 = vmatpush3.msra.mxu0 %v69_v0  ;;  %281 = vmatprep.mubr.msk.f32.mxu0 %vm78_vm0, %v64_v2  ;;  %v65_v5 = vld [vmem:[#allocation5 + $0x8] sm:$0xff]  ;;  %v173_v7 = vshrl.u32 %v172_v6, 7  ;;  %v216_v8 = vand.u32 127, %v172_v6  ;;  %v170_v11 = vunpack.c.l.s4 %v409_v10  ;;  %v262_v19 = vld [vmem:[%s486_s3] ss:$0 sm:$0xff]  ;;  %s410_s3 = smov [#allocation8]  }
  0x29   :  { %275 = vmatprep.subr.mxu0 %v68_v1  ;;  %v265_v13 = vld.sshfl [vmem:[#allocation2] sm:$0x11 pattern:$0x75316420]  ;;  %s235_s15 = sshll.u32 %s410_s3, 4  ;;  %s236_s15 = int_to_ptr.vmem [resolvable:$true] %s235_s15 }
  0x2a   :  { %276 = vmatpush3.msra.mxu0 %v68_v1  ;;  %v219_v9 = vsub.s32 %v216_v8, %v173_v7  ;;  %v171_v12 = vunpack.c.0.s8 %v170_v11  ;;  %v168_v14 = vcombine.high %v265_v13, %v265_v13  ;;  %v185_v17 = vsub.s32 0, %v173_v7  ;;  %v266_v30 = vld [vmem:[%s487_s4] ss:$0 sm:$0xff]  ;;  %s356_s16 = scalar_lea.vmem %s236_s15, 256  ;;  %p361_p2 = scmp.lt.s32.totalorder %s236_s15, %s236_s15 }
  0x2b   :  { %277 = vmatprep.subr.mxu0 %v67_v3  ;;  %p357_p1 = scmp.ne.s32.totalorder %s236_s15, %s356_s16  ;;  %p362_p3 = scmp.lt.s32.totalorder %s356_s16, %s356_s16 }
  0x2c   :  { %278 = vmatpush3.msra.mxu0 %v67_v3  ;;  %v174_v15 = vsub.s32 %v171_v12, %v173_v7 }
  0x2d   :  { %279 = vmatprep.subr.mxu0 %v66_v4  ;;  %p363_p4 = por %p362_p3, %p361_p2 }
  0x2e   :  { %280 = vmatpush3.msra.mxu0 %v66_v4  ;;  %v182_v16 = vrot.slane %v168_v14, %v174_v15  ;;  %v175_v18 = vrot.slane %v265_v13, %v174_v15 }
  0x2f   :  { %282 = vmatmul.mubr.msk.f32.vlgmr.msra.gmra.mxu0 %vm78_vm0, %v65_v5  ;;  %p364_p5 = pnand %p363_p4, %p357_p1 }
  0x30   :  { %v190_v20 = vrot.slane %v182_v16, %v185_v17  ;;  %v186_v23 = vrot.slane %v175_v18, %v185_v17 }
  0xef   :  { %v283_v21 = vpop.f32.mrf.mxu0 }
  0xf0   :  { %v157_v22 = vadd.f32 %v283_v21, %v262_v19 }
  0xf1   :  { %v151_v24 = vpop.f32.mrf.mxu0 }
  0xf2   :  { %v194_v25 = vadd.f32 %v190_v20, %v157_v22  ;;  %212 = vst.msk [vmem:[#allocation8 + $0x8] sm:$0xff] %vm78_vm0, %v157_v22  ;;  %v152_v26 = vadd.f32 %v262_v19, %v151_v24 }
  0xf4   :  { %v193_v27 = vadd.f32 %v186_v23, %v152_v26  ;;  %211 = vst.msk [vmem:[#allocation8] sm:$0xff] %vm78_vm0, %v152_v26  ;;  %292 = vtanh.f32 %v194_v25 }
  0xf6   :  { %294 = vtanh.f32 %v193_v27 }
 0x101   :  { %v293_v28 = vpop.eup %292 }
 0x102   :  { %v204_v33 = vmul.f32 %v293_v28, %v266_v30 }
 0x103   :  { %v295_v29 = vpop.eup %294 }
 0x104   :  { %v203_v31 = vmul.f32 %v295_v29, %v266_v30  ;;  %v208_v34 = vsel %vm78_vm0, %v204_v33, 0.0 }
 0x106   :  { %v205_v32 = vsel %vm78_vm0, %v203_v31, 0.0 }
 0x107   :  { %206 = vadd.xlane.f32.xlu0 %v205_v32 }
 0x10b   :  { %209 = vadd.xlane.f32.xlu0 %v208_v34 }
 0x10c   :  { %367 = shalt.err (!%p364_p5)
}
 0x10d   :  { %241 = dma.vmem_to_hbm [thread:$0]  %s236_s15, 256, %s488_s5, [#allocation4], %s405_s24, %s405_s24, %s406_s25   ;;  %vm225_vm1 = vcmask 1041409   ;;  %vm228_vm2 = vcmask 58368  }
 0x10e   :  { %s411_s18 = smov [#allocation9]  }
 0x10f   :  { %s248_s19 = sshll.u32 %s411_s18, 4  ;;  %s249_s19 = int_to_ptr.vmem [resolvable:$true] %s248_s19 }
 0x110   :  { %s376_s20 = scalar_lea.vmem %s249_s19, 32  ;;  %p381_p7 = scmp.lt.s32.totalorder %s249_s19, %s249_s19 }
 0x111   :  { %p377_p6 = scmp.ne.s32.totalorder %s249_s19, %s376_s20  ;;  %p382_p8 = scmp.lt.s32.totalorder %s376_s20, %s376_s20 }
 0x113   :  { %p383_p9 = por %p382_p8, %p381_p7 }
 0x115   :  { %p384_p10 = pnand %p383_p9, %p377_p6 }
 0x190   :  { %v207_v35 = vpop.xlane.xlu0 %206 }
 0x191   :  { %v220_v37 = vrot.slane %v207_v35, %v219_v9 }
 0x194   :  { %v210_v36 = vpop.xlane.xlu0 %209 }
 0x195   :  { %v224_v38 = vrot.slane %v210_v36, %v219_v9 }
 0x197   :  { %v226_v39 = vsel %vm225_vm1, %v224_v38, %v220_v37 }
 0x198   :  { %229 = vst.msk [vmem:[#allocation9] sm:$0x3] %vm228_vm2, %v226_v39 }
 0x199   :  { %387 = shalt.err (!%p384_p10)
}
 0x19a   :  { %251 = dma.vmem_to_hbm [thread:$0]  %s249_s19, 32, %s489_s6, [#allocation10]  }
 0x19b   :  { %400 = dma.done.wait [#allocation4], 256  }
 0x19c   :  { %401 = vsyncadd [#allocation4], 4294967040 }
 0x19d   :  { %402 = dma.done.wait [#allocation10], 32  }
 0x19e   :  { %403 = vsyncadd [#allocation10], 4294967264 }
 0x19f   :  { %258 = vsyncpa [#allocation3], 1 }
 0x1a0   :  { %259 = vsyncpa [#allocation6], 1 }
 0x1a1   :  { %260 = vsyncpa [#allocation4], 1 }
 0x1a2   :  { %261 = vsyncpa [#allocation10], 1 }

</bundles_post_ra>
